<compile_context>
chip_gen: v7x
topology: tpu7x:2x2x1
jax: 0.10.0
libtpu: 0.0.40
codegen_flags: <defaults>
</compile_context>

<pallas_src>
import numpy as np

import jax
import jax.numpy as jnp
from jax.experimental import pallas as pl
from jax.experimental.pallas import tpu as pltpu


# ---------------------------------------------------------------------------
# Kernel
# ---------------------------------------------------------------------------
def _patch_embed_kernel(x_ref, w_ref, b_ref, o_ref):
    # One grid step: (tile_m, K) patch rows @ resident (K, N) weight.
    # f32 accumulate on the MXU, f32 bias add, single cast at the store.
    acc = jnp.dot(x_ref[...], w_ref[...], preferred_element_type=jnp.float32)
    o_ref[...] = (acc + b_ref[...]).astype(o_ref.dtype)


# ---------------------------------------------------------------------------
# Tiling / VMEM heuristics
# ---------------------------------------------------------------------------
def _round_up(x, m):
    return ((x + m - 1) // m) * m


def _vmem_budget_bytes():
    """Usable VMEM budget, generation-aware with a safe fallback.

    v5e/v6e have 128 MiB physical VMEM, v7x only 64 MiB.  Use 3/4 of whatever
    the runtime reports (-> ~96 MiB on v5e/v6e, ~48 MiB on v7x); fall back to
    64 MiB physical (-> 48 MiB budget, safe everywhere) if the query fails.
    """
    cap = 64 * 1024 * 1024
    try:
        cap = int(pltpu.get_tpu_info().vmem_capacity_bytes)
    except Exception:
        pass
    return (cap * 3) // 4


_STEP_OVERHEAD_ROWS = 160   # ~0.35 us per grid step, in row-equivalents
_TILE_CANDIDATES = (2048, 1792, 1536, 1280, 1024, 896, 768, 640, 512, 384,
                    256, 128)


def _choose_tile_m(M, fits):
    """Pick the GEMM row tile.

    Heuristic cost = padded rows on a 1-TC part (v5e/v6e serial grid)
                   + 2 * max-rows-per-core on a 2-TC part (v7x megacore,
                     the 'parallel' grid axis is split across cores)
                   + per-grid-step overhead.
    Candidates are 128/256-aligned (MXU-friendly) plus a single 16-aligned
    tile covering all of M; only tiles fitting the VMEM budget are considered.
    """
    if M <= 256:
        return _round_up(M, 16)          # one small tile, bf16 sublane aligned
    cands = {min(_round_up(M, 16), _TILE_CANDIDATES[0])}
    cands.update(t for t in _TILE_CANDIDATES if t <= _round_up(M, 16))
    best_tile, best_cost = None, None
    for tile in sorted(cands, reverse=True):
        if not fits(tile):
            continue
        steps = pl.cdiv(M, tile)
        work_1tc = steps * tile                      # v5e/v6e: serial grid
        work_2tc = pl.cdiv(steps, 2) * tile * 2      # v7x: busier of 2 TCs
        cost = work_1tc + work_2tc + 2 * steps * _STEP_OVERHEAD_ROWS
        if best_cost is None or cost < best_cost:
            best_tile, best_cost = tile, cost
    return best_tile if best_tile is not None else 128


# ---------------------------------------------------------------------------
# pallas_call wrapper
# ---------------------------------------------------------------------------
def patch_embed_matmul(patches, weight, bias, *, out_dtype):
    """patches [M, K] @ weight [K, N] + bias [1, N] -> [M, N] in out_dtype."""
    M, K = patches.shape
    _, N = weight.shape
    in_bytes = patches.dtype.itemsize
    w_bytes = weight.dtype.itemsize
    out_bytes = jnp.dtype(out_dtype).itemsize

    budget = _vmem_budget_bytes()
    # Double-buffered VMEM footprint model: weight + bias are fixed (constant
    # index_map -> fetched once, but the pipeline still reserves 2 buffers;
    # at these sizes that is <2 MiB so no pipeline_mode override is needed),
    # the per-row part covers the patch and output tiles.
    fixed_bytes = 2 * K * N * w_bytes + 2 * N * bias.dtype.itemsize
    per_row_bytes = 2 * (K * in_bytes + N * out_bytes)
    fits = lambda t: fixed_bytes + t * per_row_bytes <= budget // 2

    tile_m = _choose_tile_m(M, fits)
    m_pad = pl.cdiv(M, tile_m) * tile_m
    if m_pad != M:                                   # zero-pad -> no edge masking
        patches = jnp.pad(patches, ((0, m_pad - M), (0, 0)))
    grid = (m_pad // tile_m,)

    need = fixed_bytes + tile_m * per_row_bytes
    vmem_limit = int(min(max(need * 3 // 2, 16 * 1024 * 1024), budget))
    vmem_limit = max(vmem_limit, need + (1 << 20))

    cost = pl.CostEstimate(
        flops=2 * m_pad * K * N,
        transcendentals=0,
        bytes_accessed=(m_pad * K * in_bytes + K * N * w_bytes
                        + N * bias.dtype.itemsize + m_pad * N * out_bytes))

    out = pl.pallas_call(
        _patch_embed_kernel,
        out_shape=jax.ShapeDtypeStruct((m_pad, N), out_dtype),
        grid_spec=pltpu.PrefetchScalarGridSpec(
            num_scalar_prefetch=0,
            grid=grid,
            in_specs=[
                pl.BlockSpec((tile_m, K), lambda i: (i, 0)),
                pl.BlockSpec((K, N), lambda i: (0, 0)),   # resident weight
                pl.BlockSpec((1, N), lambda i: (0, 0)),   # resident bias (f32)
            ],
            out_specs=pl.BlockSpec((tile_m, N), lambda i: (i, 0)),
        ),
        compiler_params=pltpu.CompilerParams(
            dimension_semantics=("parallel",),
            vmem_limit_bytes=vmem_limit,
        ),
        cost_estimate=cost,
    )(patches, weight, bias)

    return out[:M] if m_pad != M else out


# ---------------------------------------------------------------------------
# Module
# ---------------------------------------------------------------------------
class CustomPatchEmbedPallas:
    """JAX/Pallas equivalent of the PyTorch CustomPatchEmbed module.

    compute_dtype: MXU operand dtype (bf16 default; set jnp.float32 for
                   closer bit-parity with the f32 nn.Conv2d at ~2-4x MXU cost).
    out_dtype:     output dtype (bf16 default per perf review; f32 accumulate
                   and f32 bias add are kept regardless).
    """

    def __init__(self, img_size=224, patch_size=16, in_channels=3,
                 embed_dim=768, custom_order=None, key=None,
                 compute_dtype=jnp.bfloat16, out_dtype=jnp.bfloat16):
        self.img_size = (img_size, img_size)
        self.patch_size = (patch_size, patch_size)
        self.in_channels = in_channels
        self.embed_dim = embed_dim
        self.compute_dtype = jnp.dtype(compute_dtype)
        self.out_dtype = jnp.dtype(out_dtype)

        gh = self.img_size[0] // self.patch_size[0]
        gw = self.img_size[1] // self.patch_size[1]
        self.num_patches = gh * gw

        if custom_order is not None:
            order = np.asarray(custom_order)
            assert order.shape[0] == self.num_patches
        else:
            order = np.arange(self.num_patches)
        self._identity_order = bool(
            np.array_equal(order, np.arange(self.num_patches)))
        self.custom_order = jnp.asarray(order, dtype=jnp.int32)

        # Deterministic parameter init (same shapes as nn.Conv2d).
        if key is None:
            key = jax.random.PRNGKey(0)
        kw, kb = jax.random.split(key)
        ph, pw = self.patch_size
        fan_in = in_channels * ph * pw
        bound = 1.0 / float(np.sqrt(fan_in))
        self.conv_weight = jax.random.uniform(
            kw, (embed_dim, in_channels, ph, pw),
            minval=-bound, maxval=bound, dtype=jnp.float32)
        self.conv_bias = jax.random.uniform(
            kb, (embed_dim,), minval=-bound, maxval=bound, dtype=jnp.float32)

        # GEMM form of the conv weight: [K, E], K zero-padded to 128 lanes.
        self._K = fan_in
        self._K_pad = _round_up(fan_in, 128)
        w_mat = (self.conv_weight.reshape(embed_dim, fan_in).T
                 .astype(self.compute_dtype))
        if self._K_pad != self._K:
            w_mat = jnp.pad(w_mat, ((0, self._K_pad - self._K), (0, 0)))
        self._w_mat = w_mat
        self._b_mat = self.conv_bias.reshape(1, embed_dim).astype(jnp.float32)

        # jit the whole forward so im2col transpose + gather + cast + pads
        # fuse into one XLA layout pass over x.
        self._jit_forward = jax.jit(self._forward)

    def _forward(self, x):
        # x: [B, C, H, W] (NCHW, like PyTorch).
        B, C, H, W = x.shape
        ph, pw = self.patch_size
        gh, gw = H // ph, W // pw
        assert C == self.in_channels and gh * gw == self.num_patches

        # im2col with K flattening order (C, ph, pw) — matches the conv
        # weight.  The custom_order permutation (output-side in the PyTorch
        # module) is folded into this input-side gather, and skipped entirely
        # when it is the identity.
        xp = x.reshape(B, C, gh, ph, gw, pw)
        xp = xp.transpose(0, 2, 4, 1, 3, 5)              # [B, gh, gw, C, ph, pw]
        xp = xp.reshape(B, self.num_patches, self._K)
        if not self._identity_order:
            xp = jnp.take(xp, self.custom_order, axis=1)
        patches = (xp.reshape(B * self.num_patches, self._K)
                   .astype(self.compute_dtype))
        if self._K_pad != self._K:
            patches = jnp.pad(patches, ((0, 0), (0, self._K_pad - self._K)))

        out = patch_embed_matmul(patches, self._w_mat, self._b_mat,
                                 out_dtype=self.out_dtype)
        return out.reshape(B, self.num_patches, self.embed_dim)

    def __call__(self, x):
        return self._jit_forward(x)


# ---------------------------------------------------------------------------
# Pure-JAX reference (mirrors the PyTorch forward) + smoke test
# ---------------------------------------------------------------------------
def _reference(x, weight, bias, patch_size, custom_order):
    y = jax.lax.conv_general_dilated(
        x, weight, window_strides=patch_size, padding="VALID",
        dimension_numbers=("NCHW", "OIHW", "NCHW"))
    y = y + bias.reshape(1, -1, 1, 1)
    B, E, gh, gw = y.shape
    y = y.reshape(B, E, gh * gw).transpose(0, 2, 1)
    return y[:, custom_order, :]


if __name__ == "__main__":
    # Small shapes: B=2, C=4, img=16, patch=4 -> 16 patches, embed_dim=32.
    key = jax.random.PRNGKey(0)
    k_x, k_params, k_perm = jax.random.split(key, 3)

    B, C, IMG, P, E = 2, 4, 16, 4, 32
    num_patches = (IMG // P) * (IMG // P)

    x = jax.random.normal(k_x, (B, C, IMG, IMG), dtype=jnp.float32)
    custom_order = jax.random.permutation(k_perm, num_patches)

    mod = CustomPatchEmbedPallas(img_size=IMG, patch_size=P, in_channels=C,
                                 embed_dim=E, custom_order=custom_order,
                                 key=k_params)

    out = jax.block_until_ready(mod(x))
    assert out.shape == (B, num_patches, E), out.shape
    assert out.dtype == jnp.bfloat16, out.dtype

    ref = _reference(x, mod.conv_weight, mod.conv_bias, (P, P),
                     mod.custom_order)
    # bf16 MXU operands + bf16 output vs the f32 conv reference.
    err = float(jnp.max(jnp.abs(out.astype(jnp.float32) - ref)))
    assert jnp.allclose(out.astype(jnp.float32), ref, atol=5e-2, rtol=5e-2), err

    print("KERNEL_OK")
</pallas_src>

<mosaic_0001>
module attributes {stable_mosaic.version = 11 : i64} {
  func.func @_patch_embed_kernel(%arg0: i32, %arg1: memref<32x128xbf16, #tpu.memory_space<vmem>>, %arg2: memref<128x32xbf16, #tpu.memory_space<vmem>>, %arg3: memref<1x32xf32, #tpu.memory_space<vmem>>, %arg4: memref<32x32xbf16, #tpu.memory_space<vmem>>) attributes {dimension_semantics = [#tpu.dimension_semantics<parallel>], iteration_bounds = array<i64: 1>, scalar_prefetch = 0 : i64, scratch_operands = 0 : i64, tpu.core_type = #tpu.core_type<tc>, window_params = [{transform_indices = @transform_0, window_bounds = array<i64: 32, 128>}, {pipeline_mode = #tpu.pipeline_mode<synchronous>, transform_indices = @transform_1, window_bounds = array<i64: 128, 32>}, {pipeline_mode = #tpu.pipeline_mode<synchronous>, transform_indices = @transform_2, window_bounds = array<i64: 1, 32>}, {transform_indices = @transform_3, window_bounds = array<i64: 32, 32>}]} {
    %c0 = arith.constant 0 : index
    %c0_0 = arith.constant 0 : index
    %0 = vector.load %arg1[%c0, %c0_0] : memref<32x128xbf16, #tpu.memory_space<vmem>>, vector<32x128xbf16>
    %c0_1 = arith.constant 0 : index
    %c0_2 = arith.constant 0 : index
    %1 = vector.load %arg2[%c0_1, %c0_2] : memref<128x32xbf16, #tpu.memory_space<vmem>>, vector<128x32xbf16>
    %cst = arith.constant dense<0.000000e+00> : vector<32x32xf32>
    %2 = tpu.matmul %0, %1, %cst {dimension_numbers = #tpu.dot_dimension_numbers<[1], [0], [0], [1], [0, 0, 1, 1], [], []>} : vector<32x128xbf16>, vector<128x32xbf16>, vector<32x32xf32> -> vector<32x32xf32>
    %c0_3 = arith.constant 0 : index
    %c0_4 = arith.constant 0 : index
    %3 = vector.load %arg3[%c0_3, %c0_4] : memref<1x32xf32, #tpu.memory_space<vmem>>, vector<1x32xf32>
    %4 = vector.broadcast %3 : vector<1x32xf32> to vector<32x32xf32>
    %5 = arith.addf %2, %4 : vector<32x32xf32>
    %6 = arith.truncf %5 : vector<32x32xf32> to vector<32x32xbf16>
    %c0_5 = arith.constant 0 : index
    %c0_6 = arith.constant 0 : index
    %7 = vector.load %arg4[%c0_5, %c0_6] : memref<32x32xbf16, #tpu.memory_space<vmem>>, vector<32x32xbf16>
    tpu.vector_store %arg4[%c0_5, %c0_6], %6 {strides = array<i32>} : memref<32x32xbf16, #tpu.memory_space<vmem>>, vector<32x32xbf16>,
    return
  }
  func.func @transform_0(%arg0: i32) -> (i32, i32) {
    %c0_i32 = arith.constant 0 : i32
    %c0_i32_0 = arith.constant 0 : i32
    return %arg0, %c0_i32 : i32, i32
  }
  func.func @transform_1(%arg0: i32) -> (i32, i32) {
    %c0_i32 = arith.constant 0 : i32
    %c0_i32_0 = arith.constant 0 : i32
    %c0_i32_1 = arith.constant 0 : i32
    return %c0_i32, %c0_i32_0 : i32, i32
  }
  func.func @transform_2(%arg0: i32) -> (i32, i32) {
    %c0_i32 = arith.constant 0 : i32
    %c0_i32_0 = arith.constant 0 : i32
    %c0_i32_1 = arith.constant 0 : i32
    return %c0_i32, %c0_i32_0 : i32, i32
  }
  func.func @transform_3(%arg0: i32) -> (i32, i32) {
    %c0_i32 = arith.constant 0 : i32
    %c0_i32_0 = arith.constant 0 : i32
    return %arg0, %c0_i32 : i32, i32
  }
}

</mosaic_0001>

<bundles_post_ra>
// kernel: _forward.1
= control target key start
LH: loop header
LB: loop body
LE: loop exit
PB: predicated region body
PF: predicated region fallthrough
CT: control target
= control target key end

     0   :  { %s347_s0 = inlined_call_operand.vmem [shape: bf16[32,128], index: 0, kind: input, shape index: {}]   ;;  %s348_s1 = inlined_call_operand.vmem [shape: bf16[128,32], index: 1, kind: input, shape index: {}]   ;;  %s349_s2 = inlined_call_operand.vmem [shape: f32[1,32], index: 2, kind: input, shape index: {}]   ;;  %s350_s3 = inlined_call_operand.hbm [shape: bf16[32,32], index: 3, kind: output, shape index: {}]  }
   0x1   :  { %v241_v0 = vld [vmem:[%s348_s1] sm:$0xff]   ;;  %v242_v1 = vld [vmem:[%s348_s1 + $0x8] sm:$0xff]   ;;  %v243_v2 = vld [vmem:[%s348_s1 + $0x10] sm:$0xff]  }
   0x2   :  { %218 = vmatprep.subr.bf16.mxu0 %v241_v0  ;;  %v244_v3 = vld [vmem:[%s348_s1 + $0x18] sm:$0xff]   ;;  %v249_v4 = vld [vmem:[%s347_s0] sm:$0xff]  }
   0x3   :  { %219 = vmatpush3.bf16.msra.mxu0 %v241_v0  ;;  %234 = vmatprep.mubr.bf16.mxu0 %v249_v4 }
   0x4   :  { %220 = vmatprep.subr.bf16.mxu0 %v242_v1 }
   0x7   :  { %221 = vmatpush3.bf16.msra.mxu0 %v242_v1 }
   0x8   :  { %222 = vmatprep.subr.bf16.mxu0 %v243_v2 }
   0x9   :  { %8 = vsyncpa [#allocation3], 0  ;;  %v245_v5 = vld [vmem:[%s348_s1 + $0x20] sm:$0xff]   ;;  %v246_v6 = vld [vmem:[%s348_s1 + $0x28] sm:$0xff]   ;;  %vm168_vm0 = vcmask 257024   ;;  %s275_s7 = smov [#allocation2]  }
   0xa   :  { %v247_v7 = vld [vmem:[%s348_s1 + $0x30] sm:$0xff]   ;;  %v248_v8 = vld [vmem:[%s348_s1 + $0x38] sm:$0xff]   ;;  %v250_v9 = vld [vmem:[%s347_s0 + $0x8] sm:$0xff]   ;;  %s178_s1 = sshll.u32 %s275_s7, 4  ;;  %s179_s1 = int_to_ptr.vmem [resolvable:$true] %s178_s1 }
   0xb   :  { %223 = vmatpush3.bf16.msra.mxu0 %v243_v2  ;;  %v189_v10 = vld [vmem:[%s349_s2] ss:$0 sm:$0xff]  ;;  %s251_s0 = scalar_lea.vmem %s179_s1, 256  ;;  %p256_p1 = scmp.lt.s32.totalorder %s179_s1, %s179_s1 }
   0xc   :  { %224 = vmatprep.subr.bf16.mxu0 %v244_v3  ;;  %p252_p0 = scmp.ne.s32.totalorder %s179_s1, %s251_s0  ;;  %p257_p2 = scmp.lt.s32.totalorder %s251_s0, %s251_s0 }
   0xe   :  { %p258_p3 = por %p257_p2, %p256_p1 }
   0xf   :  { %225 = vmatpush3.bf16.msra.mxu0 %v244_v3 }
  0x10   :  { %226 = vmatprep.subr.bf16.mxu0 %v245_v5  ;;  %p259_p4 = pnand %p258_p3, %p252_p0 }
  0x13   :  { %227 = vmatpush3.bf16.msra.mxu0 %v245_v5 }
  0x14   :  { %228 = vmatprep.subr.bf16.mxu0 %v246_v6 }
  0x17   :  { %229 = vmatpush3.bf16.msra.mxu0 %v246_v6 }
  0x18   :  { %230 = vmatprep.subr.bf16.mxu0 %v247_v7 }
  0x1b   :  { %231 = vmatpush3.bf16.msra.mxu0 %v247_v7 }
  0x1c   :  { %232 = vmatprep.subr.bf16.mxu0 %v248_v8 }
  0x1f   :  { %233 = vmatpush3.bf16.msra.mxu0 %v248_v8 }
  0x22   :  { %235 = vmatmul.mubr.bf16.vlgmr.msra.gmra.mrb[0].mxu0 %v250_v9 }
  0xf5   :  { %v236_v11 = vpop.f32.mrb[0].mxu0 }
  0xf6   :  { %v146_v12 = vadd.f32 %v236_v11, %v189_v10  ;;  %v137_v13 = vpop.f32.mrb[1].mxu0 }
  0xf7   :  { %v138_v14 = vadd.f32 %v189_v10, %v137_v13  ;;  %v237_v15 = vpop.f32.mrb[2].mxu0 }
  0xf8   :  { %v206_v16 = vpack.c.bf16 %v146_v12, %v146_v12  ;;  %v149_v17 = vadd.f32 %v237_v15, %v189_v10  ;;  %v140_v18 = vpop.f32.mrb[3].mxu0 }
  0xf9   :  { %v204_v19 = vpack.c.bf16 %v138_v14, %v138_v14  ;;  %v141_v20 = vadd.f32 %v189_v10, %v140_v18 }
  0xfa   :  { %171 = vst.msk [vmem:[#allocation2 + $0x8] sm:$0xf] %vm168_vm0, %v206_v16  ;;  %v207_v21 = vpack.c.bf16 %v149_v17, %v149_v17 }
  0xfb   :  { %169 = vst.msk [vmem:[#allocation2] sm:$0xf] %vm168_vm0, %v204_v19  ;;  %v205_v22 = vpack.c.bf16 %v141_v20, %v141_v20 }
  0xfc   :  { %172 = vst.msk [vmem:[#allocation2 + $0xc] sm:$0xf] %vm168_vm0, %v207_v21 }
  0xfd   :  { %170 = vst.msk [vmem:[#allocation2 + $0x4] sm:$0xf] %vm168_vm0, %v205_v22 }
  0xfe   :  { %262 = shalt.err (!%p259_p4)
}
  0xff   :  { %s263_s9 = scalar_lea.hbm %s350_s3, 256 }
 0x100   :  { %p264_p5 = scmp.ne.s32.totalorder %s350_s3, %s263_s9  ;;  %p267_p6 = scmp.lt.u32.totalorder %s263_s9, %s350_s3 }
 0x102   :  { %p269_p7 = pnand %p267_p6, %p264_p5 }
 0x104   :  { %272 = shalt.err (!%p269_p7)
}
 0x105   :  { %s276_s14 = smov 64   ;;  %s277_s15 = smov 4  }
 0x106   :  { %184 = dma.vmem_to_hbm [thread:$0]  %s179_s1, 256, %s350_s3, [#allocation3], %s276_s14, %s276_s14, %s277_s15  }
 0x107   :  { %273 = dma.done.wait [#allocation3], 256  }
 0x108   :  { %274 = vsyncadd [#allocation3], 4294967040 }
 0x109   :  { %188 = vsyncpa [#allocation3], 1 }

</bundles_post_ra>
